<compile_context>
chip_gen: v7x
topology: tpu7x:2x2x1
jax: 0.10.0
libtpu: 0.0.40
codegen_flags: <defaults>
</compile_context>

<pallas_src>
import functools

import jax
import jax.numpy as jnp
from jax import lax
from jax.experimental import pallas as pl
from jax.experimental.pallas import tpu as pltpu

ALPHA = 0.25
GAMMA = 2.0          # compile-time constant; (1-pt)^gamma done as explicit square
LANES = 128
SUBLANES = 8
SMALL_MAX_ROWS = 512       # <= this many 128-lane rows -> single-block fast path
ROW_BLOCK_LARGE = 4096     # max rows per grid step in the tiled path
N_CORE_SPLIT = 2           # parallel split of the row axis (uses both v7x TCs)


def _focal_elementwise(x, y):
    """Per-element focal loss. x: f32 logits, y: int32/f32 binary labels."""
    is_pos = (y == 1)
    alpha_t = jnp.where(is_pos, jnp.float32(ALPHA), jnp.float32(1.0 - ALPHA))

    # One exp per element, shared by the stable sigmoid and the BCE log1p term.
    e = jnp.exp(-jnp.abs(x))
    inv_1pe = 1.0 / (1.0 + e)
    probs = jnp.where(x >= 0, inv_1pe, e * inv_1pe)              # sigmoid(x)
    one_m_pt = jnp.where(is_pos, 1.0 - probs, probs)             # 1 - pt directly

    # BCE-with-logits (reduction='none'): max(x,0) - x*y + log1p(exp(-|x|))
    ce = jnp.maximum(x, 0.0) - jnp.where(is_pos, x, jnp.float32(0.0)) + jnp.log1p(e)

    # gamma == 2 -> explicit square on the VPU (no pow -> no extra EUP work)
    return alpha_t * (one_m_pt * one_m_pt) * ce


def _in_block_index(shape):
    """Flat element index within a (rows, LANES) block (fits int32 easily)."""
    rows = lax.broadcasted_iota(jnp.int32, shape, 0)
    cols = lax.broadcasted_iota(jnp.int32, shape, 1)
    return rows * shape[1] + cols


def _focal_small_kernel(n, pad, logits_ref, label_ref, out_ref):
    loss = _focal_elementwise(logits_ref[...], label_ref[...])
    if pad:  # trace-time: mask only emitted when padding actually exists
        loss = jnp.where(_in_block_index(loss.shape) < n, loss, 0.0)
    out_ref[0, 0] = jnp.sum(loss) / jnp.float32(n)


def _focal_tiled_kernel(n, row_block, tiles_per_core, pad,
                        logits_ref, label_ref, out_ref):
    c = pl.program_id(0)   # core-split axis ("parallel")
    t = pl.program_id(1)   # reduce axis ("arbitrary")

    @pl.when(t == 0)
    def _():
        out_ref[...] = jnp.zeros_like(out_ref)

    loss = _focal_elementwise(logits_ref[...], label_ref[...])

    def _fold(v):
        # Pure-VPU vreg-wise partial sum: (row_block,128) -> (8,128).
        return v.reshape(row_block // SUBLANES, SUBLANES, LANES).sum(axis=0)

    if pad == 0:
        # No padding anywhere (trace-time): never build a mask.
        out_ref[...] += _fold(loss)
    else:
        block_elems = row_block * LANES
        full_blocks = n // block_elems          # blocks fully inside valid data
        g = c * tiles_per_core + t              # global block index

        @pl.when(g < full_blocks)
        def _():
            out_ref[...] += _fold(loss)

        @pl.when(g >= full_blocks)
        def _():
            rem = n - g * block_elems           # valid elems in this block (<=0 ok)
            masked = jnp.where(_in_block_index(loss.shape) < rem, loss, 0.0)
            out_ref[...] += _fold(masked)


def focal_loss_v1(logits, label):
    """Pallas implementation of FocalLossV1(alpha=0.25, gamma=2, reduction='mean')."""
    n = 1
    for d in logits.shape:
        n *= int(d)

    x = logits.reshape(-1)
    if x.dtype != jnp.float32:
        x = x.astype(jnp.float32)
    y = label.reshape(-1)
    if not (y.dtype == jnp.int32 or y.dtype == jnp.float32):
        y = y.astype(jnp.int32)   # e.g. bool / int64 labels

    rows = pl.cdiv(n, LANES)

    if rows <= SMALL_MAX_ROWS:
        # ---- single-block fast path -------------------------------------
        row_block = ((rows + SUBLANES - 1) // SUBLANES) * SUBLANES
        pad = row_block * LANES - n
        if pad:
            x = jnp.pad(x, (0, pad))
            y = jnp.pad(y, (0, pad))
        x2 = x.reshape(row_block, LANES)
        y2 = y.reshape(row_block, LANES)

        out = pl.pallas_call(
            functools.partial(_focal_small_kernel, n, pad),
            out_shape=jax.ShapeDtypeStruct((1, 1), jnp.float32),
            grid_spec=pltpu.PrefetchScalarGridSpec(
                num_scalar_prefetch=0,
                grid=(1,),
                in_specs=[
                    pl.BlockSpec((row_block, LANES), lambda i: (0, 0)),
                    pl.BlockSpec((row_block, LANES), lambda i: (0, 0)),
                ],
                out_specs=pl.BlockSpec(memory_space=pltpu.MemorySpace.SMEM),
            ),
            compiler_params=pltpu.CompilerParams(
                dimension_semantics=("arbitrary",)),
        )(x2, y2)
        return out[0, 0]

    # ---- tiled path: (core_split, tiles_per_core) grid -------------------
    row_block = min(
        ROW_BLOCK_LARGE,
        ((pl.cdiv(rows, N_CORE_SPLIT) + SUBLANES - 1) // SUBLANES) * SUBLANES)
    tiles = pl.cdiv(rows, row_block)
    tiles = ((tiles + N_CORE_SPLIT - 1) // N_CORE_SPLIT) * N_CORE_SPLIT
    tiles_per_core = tiles // N_CORE_SPLIT

    pad = tiles * row_block * LANES - n
    if pad:
        x = jnp.pad(x, (0, pad))
        y = jnp.pad(y, (0, pad))
    x2 = x.reshape(tiles * row_block, LANES)
    y2 = y.reshape(tiles * row_block, LANES)

    partial_sums = pl.pallas_call(
        functools.partial(_focal_tiled_kernel, n, row_block, tiles_per_core, pad),
        out_shape=jax.ShapeDtypeStruct((N_CORE_SPLIT * SUBLANES, LANES),
                                       jnp.float32),
        grid_spec=pltpu.PrefetchScalarGridSpec(
            num_scalar_prefetch=0,
            grid=(N_CORE_SPLIT, tiles_per_core),
            in_specs=[
                pl.BlockSpec((row_block, LANES),
                             lambda c, t: (c * tiles_per_core + t, 0)),
                pl.BlockSpec((row_block, LANES),
                             lambda c, t: (c * tiles_per_core + t, 0)),
            ],
            # Per-core (8,128) partial-sum block, resident across the reduce axis.
            out_specs=pl.BlockSpec((SUBLANES, LANES), lambda c, t: (c, 0)),
        ),
        compiler_params=pltpu.CompilerParams(
            dimension_semantics=("parallel", "arbitrary")),
    )(x2, y2)

    # Tiny final reduce (2*8*128 floats) + divide in the wrapper.
    return jnp.sum(partial_sums) / jnp.float32(n)


def focal_loss_ref(logits, label, alpha=ALPHA, gamma=GAMMA):
    """Pure-JAX reference matching the PyTorch module exactly."""
    x = logits.astype(jnp.float32)
    y = label.astype(jnp.float32)
    is_pos = (label == 1)
    alpha_t = jnp.where(is_pos, alpha, 1.0 - alpha)
    probs = jax.nn.sigmoid(x)
    pt = jnp.where(is_pos, probs, 1.0 - probs)
    ce = jnp.maximum(x, 0.0) - x * y + jnp.log1p(jnp.exp(-jnp.abs(x)))
    loss = alpha_t * jnp.power(1.0 - pt, gamma) * ce
    return jnp.mean(loss)


if __name__ == "__main__":
    key = jax.random.PRNGKey(0)
    k1, k2, k3, k4, k5, k6 = jax.random.split(key, 6)

    # 1) Small path: NCHW logits, binary integer labels, same shape.
    logits = jax.random.normal(k1, (2, 4, 16, 16), dtype=jnp.float32) * 2.0
    label = jax.random.bernoulli(k2, 0.3, (2, 4, 16, 16)).astype(jnp.int32)
    out = jax.block_until_ready(focal_loss_v1(logits, label))
    ref = focal_loss_ref(logits, label)
    assert jnp.allclose(out, ref, rtol=1e-5, atol=1e-6), (out, ref)

    # 2) Tiled path, exact fit (no padding, unmasked accumulate).
    logits_l = jax.random.normal(k3, (2, 4, 128, 256), dtype=jnp.float32) * 2.0
    label_l = jax.random.bernoulli(k4, 0.3, (2, 4, 128, 256)).astype(jnp.int32)
    out_l = jax.block_until_ready(focal_loss_v1(logits_l, label_l))
    ref_l = focal_loss_ref(logits_l, label_l)
    assert jnp.allclose(out_l, ref_l, rtol=1e-4, atol=1e-6), (out_l, ref_l)

    # 3) Tiled path with a ragged tail (exercises the masked-accumulate branch).
    logits_r = jax.random.normal(k5, (2, 4, 128, 249), dtype=jnp.float32) * 2.0
    label_r = jax.random.bernoulli(k6, 0.3, (2, 4, 128, 249)).astype(jnp.int32)
    out_r = jax.block_until_ready(focal_loss_v1(logits_r, label_r))
    ref_r = focal_loss_ref(logits_r, label_r)
    assert jnp.allclose(out_r, ref_r, rtol=1e-4, atol=1e-6), (out_r, ref_r)

    print("KERNEL_OK")
</pallas_src>

<mosaic_0001>
module attributes {stable_mosaic.version = 11 : i64} {
  func.func @_focal_small_kernel(%arg0: i32, %arg1: memref<16x128xf32, #tpu.memory_space<vmem>>, %arg2: memref<16x128xi32, #tpu.memory_space<vmem>>, %arg3: memref<1x1xf32, #tpu.memory_space<smem>>) attributes {dimension_semantics = [#tpu.dimension_semantics<arbitrary>], iteration_bounds = array<i64: 1>, scalar_prefetch = 0 : i64, scratch_operands = 0 : i64, tpu.core_type = #tpu.core_type<tc>, window_params = [{pipeline_mode = #tpu.pipeline_mode<synchronous>, transform_indices = @transform_0, window_bounds = array<i64: 16, 128>}, {pipeline_mode = #tpu.pipeline_mode<synchronous>, transform_indices = @transform_1, window_bounds = array<i64: 16, 128>}, {transform_indices = @transform_2, window_bounds = array<i64: 1, 1>}]} {
    %c0 = arith.constant 0 : index
    %c0_0 = arith.constant 0 : index
    %0 = vector.load %arg1[%c0, %c0_0] : memref<16x128xf32, #tpu.memory_space<vmem>>, vector<16x128xf32>
    %c0_1 = arith.constant 0 : index
    %c0_2 = arith.constant 0 : index
    %1 = vector.load %arg2[%c0_1, %c0_2] : memref<16x128xi32, #tpu.memory_space<vmem>>, vector<16x128xi32>
    %c1_i32 = arith.constant 1 : i32
    %2 = vector.broadcast %c1_i32 : i32 to vector<16x128xi32>
    %3 = arith.cmpi eq, %1, %2 : vector<16x128xi32>
    %cst = arith.constant 2.500000e-01 : f32
    %cst_3 = arith.constant 7.500000e-01 : f32
    %4 = vector.broadcast %cst : f32 to vector<16x128xf32>
    %5 = vector.broadcast %cst_3 : f32 to vector<16x128xf32>
    %6 = arith.select %3, %4, %5 : vector<16x128xi1>, vector<16x128xf32>
    %7 = math.absf %0 : vector<16x128xf32>
    %cst_4 = arith.constant 0.000000e+00 : f32
    %8 = vector.broadcast %cst_4 : f32 to vector<16x128xf32>
    %9 = arith.subf %8, %7 : vector<16x128xf32>
    %10 = math.exp %9 : vector<16x128xf32>
    %cst_5 = arith.constant 1.000000e+00 : f32
    %11 = vector.broadcast %cst_5 : f32 to vector<16x128xf32>
    %12 = arith.addf %11, %10 : vector<16x128xf32>
    %cst_6 = arith.constant 1.000000e+00 : f32
    %13 = vector.broadcast %cst_6 : f32 to vector<16x128xf32>
    %14 = arith.divf %13, %12 : vector<16x128xf32>
    %cst_7 = arith.constant 0.000000e+00 : f32
    %15 = vector.broadcast %cst_7 : f32 to vector<16x128xf32>
    %16 = arith.cmpf oge, %0, %15 : vector<16x128xf32>
    %17 = arith.mulf %10, %14 : vector<16x128xf32>
    %18 = arith.select %16, %14, %17 : vector<16x128xi1>, vector<16x128xf32>
    %cst_8 = arith.constant 1.000000e+00 : f32
    %19 = vector.broadcast %cst_8 : f32 to vector<16x128xf32>
    %20 = arith.subf %19, %18 : vector<16x128xf32>
    %21 = arith.select %3, %20, %18 : vector<16x128xi1>, vector<16x128xf32>
    %cst_9 = arith.constant 0.000000e+00 : f32
    %22 = vector.broadcast %cst_9 : f32 to vector<16x128xf32>
    %23 = arith.maximumf %0, %22 : vector<16x128xf32>
    %cst_10 = arith.constant 0.000000e+00 : f32
    %24 = vector.broadcast %cst_10 : f32 to vector<16x128xf32>
    %25 = arith.select %3, %0, %24 : vector<16x128xi1>, vector<16x128xf32>
    %26 = arith.subf %23, %25 : vector<16x128xf32>
    %27 = math.log1p %10 : vector<16x128xf32>
    %28 = arith.addf %26, %27 : vector<16x128xf32>
    %29 = arith.mulf %21, %21 : vector<16x128xf32>
    %30 = arith.mulf %6, %29 : vector<16x128xf32>
    %31 = arith.mulf %30, %28 : vector<16x128xf32>
    %32 = vector.shape_cast %31 : vector<16x128xf32> to vector<1x16x128xf32>
    %cst_11 = arith.constant dense<0.000000e+00> : vector<1xf32>
    %33 = vector.multi_reduction <add>, %32, %cst_11 [1, 2] : vector<1x16x128xf32> to vector<1xf32>
    %34 = vector.shape_cast %33 : vector<1xf32> to vector<1x1x1xf32>
    %35 = vector.extract %34[0, 0, 0] : f32 from vector<1x1x1xf32>
    %cst_12 = arith.constant 2.048000e+03 : f32
    %36 = arith.divf %35, %cst_12 : f32
    %c0_13 = arith.constant 0 : index
    %c0_14 = arith.constant 0 : index
    %37 = memref.load %arg3[%c0_13, %c0_14] : memref<1x1xf32, #tpu.memory_space<smem>>
    memref.store %36, %arg3[%c0_13, %c0_14] : memref<1x1xf32, #tpu.memory_space<smem>>
    return
  }
  func.func @transform_0(%arg0: i32) -> (i32, i32) {
    %c0_i32 = arith.constant 0 : i32
    %c0_i32_0 = arith.constant 0 : i32
    %c0_i32_1 = arith.constant 0 : i32
    return %c0_i32, %c0_i32_0 : i32, i32
  }
  func.func @transform_1(%arg0: i32) -> (i32, i32) {
    %c0_i32 = arith.constant 0 : i32
    %c0_i32_0 = arith.constant 0 : i32
    %c0_i32_1 = arith.constant 0 : i32
    return %c0_i32, %c0_i32_0 : i32, i32
  }
  func.func @transform_2(%arg0: i32) -> (i32, i32) {
    %c0_i32 = arith.constant 0 : i32
    %c0_i32_0 = arith.constant 0 : i32
    %c0_i32_1 = arith.constant 0 : i32
    return %c0_i32, %c0_i32_0 : i32, i32
  }
}

</mosaic_0001>

<bundles_post_ra>
// kernel: tpu_custom_call.1
= control target key start
LH: loop header
LB: loop body
LE: loop exit
PB: predicated region body
PF: predicated region fallthrough
CT: control target
= control target key end

     0   :  { %7 = vsyncpa [#allocation3], 0  ;;  %s283_s0 = inlined_call_operand.hbm [shape: f32[16,128], index: 0, kind: input, shape index: {}]   ;;  %s284_s1 = inlined_call_operand.hbm [shape: s32[16,128], index: 1, kind: input, shape index: {}]   ;;  %s285_s2 = inlined_call_operand.hbm [shape: f32[1,1], index: 2, kind: output, shape index: {}]  }
   0x1   :  { %8 = vsyncpa [#allocation6], 0 }
   0x2   :  { %9 = vsyncpa [#allocation4], 0  ;;  %s214_s9 = smov [#allocation2]   ;;  %s154_s13 = scalar_lea.hbm %s283_s0, 256 }
   0x3   :  { %s15_s10 = sshll.u32 %s214_s9, 4  ;;  %p155_p0 = scmp.ne.s32.totalorder %s283_s0, %s154_s13  ;;  %s16_s10 = int_to_ptr.vmem [resolvable:$true] %s15_s10 }
   0x4   :  { %p158_p1 = scmp.lt.u32.totalorder %s154_s13, %s283_s0 }
   0x6   :  { %p160_p2 = pnand %p158_p1, %p155_p0 }
   0x8   :  { %163 = shalt.err (!%p160_p2)
}
   0x9   :  { %s164_s18 = scalar_lea.vmem %s16_s10, 256  ;;  %p169_p4 = scmp.lt.s32.totalorder %s16_s10, %s16_s10 }
   0xa   :  { %p165_p3 = scmp.ne.s32.totalorder %s16_s10, %s164_s18  ;;  %p170_p5 = scmp.lt.s32.totalorder %s164_s18, %s164_s18 }
   0xc   :  { %p171_p6 = por %p170_p5, %p169_p4 }
   0xe   :  { %p172_p7 = pnand %p171_p6, %p165_p3 }
  0x10   :  { %175 = shalt.err (!%p172_p7)
}
  0x11   :  { %s215_s19 = smov 128   ;;  %s216_s20 = smov 8  }
  0x12   :  { %21 = dma.hbm_to_vmem [thread:$0]  %s283_s0, 256, %s16_s10, [#allocation3], %s215_s19, %s215_s19, %s216_s20  }
  0x13   :  { %s217_s23 = smov [#allocation5]   ;;  %s176_s27 = scalar_lea.hbm %s284_s1, 256 }
  0x14   :  { %s27_s24 = sshll.u32 %s217_s23, 4  ;;  %p177_p8 = scmp.ne.s32.totalorder %s284_s1, %s176_s27  ;;  %s28_s24 = int_to_ptr.vmem [resolvable:$true] %s27_s24 }
  0x15   :  { %p180_p9 = scmp.lt.u32.totalorder %s176_s27, %s284_s1 }
  0x17   :  { %p182_p10 = pnand %p180_p9, %p177_p8 }
  0x19   :  { %185 = shalt.err (!%p182_p10)
}
  0x1a   :  { %s186_s4 = scalar_lea.vmem %s28_s24, 256  ;;  %p191_p12 = scmp.lt.s32.totalorder %s28_s24, %s28_s24 }
  0x1b   :  { %p187_p11 = scmp.ne.s32.totalorder %s28_s24, %s186_s4  ;;  %p192_p13 = scmp.lt.s32.totalorder %s186_s4, %s186_s4 }
  0x1d   :  { %p193_p0 = por %p192_p13, %p191_p12 }
  0x1f   :  { %p194_p1 = pnand %p193_p0, %p187_p11 }
  0x21   :  { %197 = shalt.err (!%p194_p1)
}
  0x22   :  { %33 = dma.hbm_to_vmem [thread:$0]  %s284_s1, 256, %s28_s24, [#allocation6], %s215_s19, %s215_s19, %s216_s20  }
  0x23   :  { %208 = dma.done.wait [#allocation3], 256  }
  0x24   :  { %209 = vsyncadd [#allocation3], 4294967040 }
  0x25   :  { %210 = dma.done.wait [#allocation6], 256  }
  0x26   :  { %211 = vsyncadd [#allocation6], 4294967040  ;;  %v40_v0 = vld [vmem:[#allocation2] sm:$0xff]  ;;  %v41_v1 = vld [vmem:[#allocation2 + $0x8] sm:$0xff]  ;;  %v218_v42 = vmov 0.75   ;;  %s198_s9 = scalar_lea.hbm %s285_s2, 16 }
  0x27   :  { %v48_v2 = vand.u32 2147483647, %v40_v0  ;;  %v49_v3 = vand.u32 2147483647, %v41_v1  ;;  %v42_v13 = vld [vmem:[#allocation5] sm:$0xff]  ;;  %v43_v15 = vld [vmem:[#allocation5 + $0x8] sm:$0xff]  ;;  %p199_p2 = scmp.ne.s32.totalorder %s285_s2, %s198_s9  ;;  %p202_p3 = scmp.lt.u32.totalorder %s198_s9, %s285_s2 }
  0x28   :  { %vm44_vm0 = vcmp.eq.s32.totalorder %v42_v13, 1  ;;  %vm45_vm1 = vcmp.eq.s32.totalorder %v43_v15, 1  ;;  %v72_v19 = vmax.f32 %v40_v0, 0.0  ;;  %vm62_vm2 = vcmp.ge.f32.partialorder %v40_v0, 0.0 }
  0x29   :  { %v50_v4 = vsub.f32 0.0, %v48_v2  ;;  %v51_v5 = vsub.f32 0.0, %v49_v3  ;;  %v73_v22 = vmax.f32 %v41_v1, 0.0  ;;  %v74_v23 = vsel %vm44_vm0, %v40_v0, 0.0  ;;  %p204_p4 = pnand %p202_p3, %p199_p2 }
  0x2a   :  { %vm63_vm3 = vcmp.ge.f32.partialorder %v41_v1, 0.0  ;;  %v75_v26 = vsel %vm45_vm1, %v41_v1, 0.0  ;;  %v76_v34 = vsub.f32 %v72_v19, %v74_v23  ;;  %v46_v43 = vsel %vm44_vm0, 0.25, %v218_v42 }
  0x2b   :  { %v52_v6 = vmul.f32 1.442695, %v50_v4  ;;  %v54_v7 = vmul.f32 1.442695, %v51_v5  ;;  %v77_v38 = vsub.f32 %v73_v22, %v75_v26  ;;  %v47_v46 = vsel %vm45_vm1, 0.25, %v218_v42 }
  0x2d   :  { %142 = vpow2.f32 %v52_v6 }
  0x2e   :  { %144 = vpow2.f32 %v54_v7 }
  0x37   :  { %v143_v8 = vpop.eup %142 }
  0x38   :  { %v145_v9 = vpop.eup %144  ;;  %v56_v10 = vadd.f32 1.0, %v143_v8  ;;  %v81_v12 = vmul.f32 -0.5, %v143_v8  ;;  %v84_v17 = vand.u32 2147483647, %v143_v8 }
  0x39   :  { %v57_v11 = vadd.f32 1.0, %v145_v9  ;;  %v90_v14 = vmul.f32 -0.5, %v145_v9  ;;  %v93_v20 = vand.u32 2147483647, %v145_v9 }
  0x3a   :  { %146 = vrcp.f32 %v56_v10  ;;  %v82_v16 = vadd.f32 1.0, %v81_v12  ;;  %vm261_vm4 = vcmp.lt.f32.partialorder %v84_v17, 0.0004427343 }
  0x3b   :  { %148 = vrcp.f32 %v57_v11  ;;  %v91_v18 = vadd.f32 1.0, %v90_v14  ;;  %vm94_vm5 = vcmp.lt.f32.partialorder %v93_v20, 0.0004427343 }
  0x3c   :  { %150 = vlog2.f32 %v56_v10  ;;  %v83_v27 = vmul.f32 %v143_v8, %v82_v16 }
  0x3d   :  { %152 = vlog2.f32 %v57_v11  ;;  %v92_v31 = vmul.f32 %v145_v9, %v91_v18 }
  0x44   :  { %v147_v21 = vpop.eup %146 }
  0x45   :  { %v149_v24 = vpop.eup %148  ;;  %v64_v25 = vmul.f32 %v147_v21, %v143_v8 }
  0x46   :  { %v151_v28 = vpop.eup %150  ;;  %v65_v29 = vmul.f32 %v149_v24, %v145_v9 }
  0x47   :  { %v153_v32 = vpop.eup %152  ;;  %v66_v33 = vsel %vm62_vm2, %v147_v21, %v64_v25  ;;  %v80_v35 = vmul.f32 0.6931472, %v151_v28 }
  0x48   :  { %v67_v36 = vsel %vm63_vm3, %v149_v24, %v65_v29  ;;  %v68_v37 = vsub.f32 1.0, %v66_v33  ;;  %v89_v39 = vmul.f32 0.6931472, %v153_v32 }
  0x49   :  { %v69_v40 = vsub.f32 1.0, %v67_v36  ;;  %v86_v41 = vsel %vm261_vm4, %v83_v27, %v80_v35 }
  0x4a   :  { %v70_v44 = vsel %vm44_vm0, %v68_v37, %v66_v33  ;;  %v95_v45 = vsel %vm94_vm5, %v92_v31, %v89_v39  ;;  %v96_v48 = vadd.f32 %v86_v41, %v76_v34 }
  0x4b   :  { %v71_v47 = vsel %vm45_vm1, %v69_v40, %v67_v36  ;;  %v98_v49 = vmul.f32 %v70_v44, %v70_v44  ;;  %v97_v50 = vadd.f32 %v95_v45, %v77_v38 }
  0x4c   :  { %v99_v51 = vmul.f32 %v71_v47, %v71_v47 }
  0x4d   :  { %v100_v52 = vmul.f32 %v98_v49, %v46_v43 }
  0x4e   :  { %v101_v53 = vmul.f32 %v99_v51, %v47_v46 }
  0x4f   :  { %v102_v54 = vmul.f32 %v100_v52, %v96_v48 }
  0x50   :  { %v103_v55 = vmul.f32 %v101_v53, %v97_v50 }
  0x52   :  { %v104_v56 = vadd.f32 %v103_v55, %v102_v54 }
  0x54   :  { %105 = vadd.xlane.f32.xlu0 %v104_v56 }
  0xe1   :  { %v106_v57 = vpop.xlane.xlu0 %105 }
  0xe2   :  { %v107_v58 = vrot.slane %v106_v57, 4 }
  0xe4   :  { %v108_v59 = vadd.f32 %v107_v58, %v106_v57 }
  0xe6   :  { %v109_v60 = vrot.slane %v108_v59, 2 }
  0xe8   :  { %v110_v61 = vadd.f32 %v109_v60, %v108_v59 }
  0xea   :  { %v111_v62 = vrot.slane %v110_v61, 1 }
  0xec   :  { %v112_v63 = vadd.f32 %v111_v62, %v110_v61 }
  0xee   :  { %134 = vpush %v112_v63 }
 0x11f   :  { %s135_s1 = spop %134 }
 0x120   :  { %s116_s6 = smul.f32 0.00048828125, %s135_s1 }
 0x122   :  { %118 = sst [smem:[#allocation7]] %s116_s6 }
 0x123   :  { %207 = shalt.err (!%p204_p4)
}
 0x124   :  { %s219_s14 = smov [#allocation7]  }
 0x125   :  { %126 = dma.smem_to_hbm %s219_s14, 16, %s285_s2, [#allocation4]  }
 0x126   :  { %212 = dma.done.wait [#allocation4], 16  }
 0x127   :  { %213 = vsyncadd [#allocation4], 4294967280 }
 0x128   :  { %130 = sfence }
 0x129   :  { %131 = vsyncpa [#allocation3], 1 }
 0x12a   :  { %132 = vsyncpa [#allocation6], 1 }
 0x12b   :  { %133 = vsyncpa [#allocation4], 1 }

</bundles_post_ra>
